<compile_context>
chip_gen: v6e
topology: v6e:2x2x1
jax: 0.10.0
libtpu: 0.0.40
codegen_flags: <defaults>
</compile_context>

<pallas_src>
import jax
import jax.numpy as jnp
from jax import lax
from jax.experimental import pallas as pl
from jax.experimental.pallas import tpu as pltpu


def _round_up(x, m):
    return (x + m - 1) // m * m


def _dice_partial_kernel(x_ref, t_ref, int_ref, den_ref,
                         acc_int, acc_s, acc_cnt):
    # x_ref: (C, TN) logits (native dtype), t_ref: (1, TN) int32 labels.
    # int_ref / den_ref: (1, C, 1) per-split partial sums.
    # acc_*: (C, TN) f32 lane-resident accumulators (VMEM scratch).
    n = pl.program_id(1)

    @pl.when(n == 0)
    def _init():
        acc_int[...] = jnp.zeros_like(acc_int)
        acc_s[...] = jnp.zeros_like(acc_s)
        acc_cnt[...] = jnp.zeros_like(acc_cnt)

    x = x_ref[...].astype(jnp.float32)
    # Stable, branch-free sigmoid: single EUP tanh, no exp(-x) inf transient.
    s = 0.5 * (jnp.tanh(0.5 * x) + 1.0)

    C, TN = x.shape
    ch = lax.broadcasted_iota(jnp.int32, (C, TN), 0)
    mask = t_ref[...] == ch                      # (1,TN) broadcast vs (C,TN)

    # Steady-state: plain VPU adds into lane-wide accumulators.  No one-hot
    # f32 tensor beyond the count term, no per-tile XLU reduce, no narrow
    # (C,1) masked stores inside the hot loop.
    acc_int[...] += jnp.where(mask, s, 0.0)
    acc_s[...] += s
    acc_cnt[...] += mask.astype(jnp.float32)

    @pl.when(n == pl.num_programs(1) - 1)
    def _finalize():
        intersect = jnp.sum(acc_int[...], axis=-1, keepdims=True)          # (C,1)
        denom = (jnp.sum(acc_s[...], axis=-1, keepdims=True)
                 + jnp.sum(acc_cnt[...], axis=-1, keepdims=True))          # (C,1)
        int_ref[...] = intersect[None, :, :]
        den_ref[...] = denom[None, :, :]


def dice_loss_2d(logits, target, *, epsilon=1e-5, tile_n=8192, num_splits=2):
    """Matches DiceLoss2D.forward (sigmoid normalization).

    logits: (C, H, W) float (any float dtype), target: (1, H, W) int labels in [0, C).
    Returns (loss, per_channel_dice).
    """
    C, H, W = logits.shape
    N = H * W

    x = logits.reshape(C, N)                       # keep native dtype (bf16 stays bf16)
    t = target.reshape(1, N).astype(jnp.int32)

    # Lane-aligned tile on the spatial axis, modest enough to fit the default
    # scoped VMEM on all generations (v5e 16 MiB, v6e/v7x 32 MiB) with
    # double-buffering + 3 f32 accumulators.
    tn = max(128, min(_round_up(tile_n, 128), _round_up(N, 128)))
    n_pad = _round_up(N, tn * num_splits)
    if n_pad != N:
        pad = n_pad - N
        x = jnp.pad(x, ((0, 0), (0, pad)), constant_values=-1e9)  # sigmoid -> 0
        t = jnp.pad(t, ((0, 0), (0, pad)), constant_values=C)     # no class match
    n_inner = n_pad // (tn * num_splits)

    itemsize = jnp.dtype(x.dtype).itemsize
    cost = pl.CostEstimate(
        flops=6 * C * n_pad,
        transcendentals=C * n_pad,
        bytes_accessed=C * n_pad * itemsize + n_pad * 4 + 2 * num_splits * C * 4,
    )

    int_parts, den_parts = pl.pallas_call(
        _dice_partial_kernel,
        out_shape=(
            jax.ShapeDtypeStruct((num_splits, C, 1), jnp.float32),
            jax.ShapeDtypeStruct((num_splits, C, 1), jnp.float32),
        ),
        grid_spec=pltpu.PrefetchScalarGridSpec(
            num_scalar_prefetch=0,
            grid=(num_splits, n_inner),
            in_specs=[
                pl.BlockSpec((C, tn), lambda p, n: (0, p * n_inner + n)),
                pl.BlockSpec((1, tn), lambda p, n: (0, p * n_inner + n)),
            ],
            out_specs=(
                pl.BlockSpec((1, C, 1), lambda p, n: (p, 0, 0)),
                pl.BlockSpec((1, C, 1), lambda p, n: (p, 0, 0)),
            ),
            scratch_shapes=[pltpu.VMEM((C, tn), jnp.float32)] * 3,
        ),
        compiler_params=pltpu.CompilerParams(
            dimension_semantics=("parallel", "arbitrary"),
        ),
        cost_estimate=cost,
    )(x, t)

    intersect = jnp.sum(int_parts[:, :, 0], axis=0)   # (C,)
    denom = jnp.sum(den_parts[:, :, 0], axis=0)       # (C,)
    per_channel_dice = 2.0 * intersect / jnp.maximum(denom, epsilon)
    loss = jnp.mean(1.0 - per_channel_dice)
    # TODO(synk): the PyTorch module returns DSC as a host numpy array via
    # .cpu().detach().numpy(); here it is returned as a device array.
    return loss, per_channel_dice


def _reference(logits, target, *, epsilon=1e-5):
    C, H, W = logits.shape
    s = jax.nn.sigmoid(logits.astype(jnp.float32)).reshape(C, -1)
    onehot = jax.nn.one_hot(target.reshape(-1), C, dtype=jnp.float32).T  # (C, N)
    intersect = (s * onehot).sum(-1)
    denom = (s + onehot).sum(-1)
    dice = 2.0 * intersect / jnp.maximum(denom, epsilon)
    return jnp.mean(1.0 - dice), dice


if __name__ == "__main__":
    classes, H, W = 4, 24, 24
    key = jax.random.PRNGKey(0)
    k1, k2 = jax.random.split(key)

    logits = jax.random.normal(k1, (classes, H, W), dtype=jnp.float32)
    target = jax.random.randint(k2, (1, H, W), 0, classes, dtype=jnp.int32)

    # Small tile so the demo exercises padding, multi-step accumulation and
    # the parallel split path (grid = (2, 3) for N=576 padded to 768).
    loss, dsc = dice_loss_2d(logits, target, tile_n=128, num_splits=2)
    jax.block_until_ready((loss, dsc))

    ref_loss, ref_dsc = _reference(logits, target)
    assert jnp.allclose(loss, ref_loss, atol=1e-5, rtol=1e-5), (loss, ref_loss)
    assert jnp.allclose(dsc, ref_dsc, atol=1e-5, rtol=1e-5), (dsc, ref_dsc)

    print("KERNEL_OK")
</pallas_src>

<mosaic_0001>
module attributes {stable_mosaic.version = 11 : i64} {
  func.func @_dice_partial_kernel(%arg0: i32, %arg1: i32, %arg2: memref<4x128xf32, #tpu.memory_space<vmem>>, %arg3: memref<1x128xi32, #tpu.memory_space<vmem>>, %arg4: memref<1x4x1xf32, #tpu.memory_space<vmem>>, %arg5: memref<1x4x1xf32, #tpu.memory_space<vmem>>, %arg6: memref<4x128xf32, #tpu.memory_space<vmem>>, %arg7: memref<4x128xf32, #tpu.memory_space<vmem>>, %arg8: memref<4x128xf32, #tpu.memory_space<vmem>>) attributes {dimension_semantics = [#tpu.dimension_semantics<parallel>, #tpu.dimension_semantics<arbitrary>], iteration_bounds = array<i64: 2, 3>, scalar_prefetch = 0 : i64, scratch_operands = 3 : i64, tpu.core_type = #tpu.core_type<tc>, window_params = [{transform_indices = @transform_0, window_bounds = array<i64: 4, 128>}, {transform_indices = @transform_1, window_bounds = array<i64: 1, 128>}, {transform_indices = @transform_2, window_bounds = array<i64: 1, 4, 1>}, {transform_indices = @transform_3, window_bounds = array<i64: 1, 4, 1>}]} {
    %c0_i32 = arith.constant 0 : i32
    %0 = arith.cmpi eq, %arg1, %c0_i32 : i32
    %1 = arith.extui %0 : i1 to i32
    %c0_i32_0 = arith.constant 0 : i32
    %2 = arith.cmpi ne, %1, %c0_i32_0 : i32
    scf.if %2 {
      %cst_20 = arith.constant 0.000000e+00 : f32
      %31 = vector.broadcast %cst_20 : f32 to vector<4x128xf32>
      %c0_21 = arith.constant 0 : index
      %c0_22 = arith.constant 0 : index
      %32 = vector.load %arg6[%c0_21, %c0_22] : memref<4x128xf32, #tpu.memory_space<vmem>>, vector<4x128xf32>
      tpu.vector_store %arg6[%c0_21, %c0_22], %31 {strides = array<i32>} : memref<4x128xf32, #tpu.memory_space<vmem>>, vector<4x128xf32>,
      %cst_23 = arith.constant 0.000000e+00 : f32
      %33 = vector.broadcast %cst_23 : f32 to vector<4x128xf32>
      %c0_24 = arith.constant 0 : index
      %c0_25 = arith.constant 0 : index
      %34 = vector.load %arg7[%c0_24, %c0_25] : memref<4x128xf32, #tpu.memory_space<vmem>>, vector<4x128xf32>
      tpu.vector_store %arg7[%c0_24, %c0_25], %33 {strides = array<i32>} : memref<4x128xf32, #tpu.memory_space<vmem>>, vector<4x128xf32>,
      %cst_26 = arith.constant 0.000000e+00 : f32
      %35 = vector.broadcast %cst_26 : f32 to vector<4x128xf32>
      %c0_27 = arith.constant 0 : index
      %c0_28 = arith.constant 0 : index
      %36 = vector.load %arg8[%c0_27, %c0_28] : memref<4x128xf32, #tpu.memory_space<vmem>>, vector<4x128xf32>
      tpu.vector_store %arg8[%c0_27, %c0_28], %35 {strides = array<i32>} : memref<4x128xf32, #tpu.memory_space<vmem>>, vector<4x128xf32>,
    } else {
    }
    %c0 = arith.constant 0 : index
    %c0_1 = arith.constant 0 : index
    %3 = vector.load %arg2[%c0, %c0_1] : memref<4x128xf32, #tpu.memory_space<vmem>>, vector<4x128xf32>
    %cst = arith.constant 5.000000e-01 : f32
    %4 = vector.broadcast %cst : f32 to vector<4x128xf32>
    %5 = arith.mulf %4, %3 : vector<4x128xf32>
    %6 = math.tanh %5 : vector<4x128xf32>
    %cst_2 = arith.constant 1.000000e+00 : f32
    %7 = vector.broadcast %cst_2 : f32 to vector<4x128xf32>
    %8 = arith.addf %6, %7 : vector<4x128xf32>
    %cst_3 = arith.constant 5.000000e-01 : f32
    %9 = vector.broadcast %cst_3 : f32 to vector<4x128xf32>
    %10 = arith.mulf %9, %8 : vector<4x128xf32>
    %11 = tpu.iota {dimensions = array<i32: 0>} : vector<4x128xi32>
    %c0_4 = arith.constant 0 : index
    %c0_5 = arith.constant 0 : index
    %12 = vector.load %arg3[%c0_4, %c0_5] : memref<1x128xi32, #tpu.memory_space<vmem>>, vector<1x128xi32>
    %13 = vector.broadcast %12 : vector<1x128xi32> to vector<4x128xi32>
    %14 = arith.cmpi eq, %13, %11 : vector<4x128xi32>
    %c0_6 = arith.constant 0 : index
    %c0_7 = arith.constant 0 : index
    %15 = vector.load %arg6[%c0_6, %c0_7] : memref<4x128xf32, #tpu.memory_space<vmem>>, vector<4x128xf32>
    %cst_8 = arith.constant 0.000000e+00 : f32
    %16 = vector.broadcast %cst_8 : f32 to vector<4x128xf32>
    %17 = arith.select %14, %10, %16 : vector<4x128xi1>, vector<4x128xf32>
    %18 = arith.addf %15, %17 : vector<4x128xf32>
    %c0_9 = arith.constant 0 : index
    %c0_10 = arith.constant 0 : index
    %19 = vector.load %arg6[%c0_9, %c0_10] : memref<4x128xf32, #tpu.memory_space<vmem>>, vector<4x128xf32>
    tpu.vector_store %arg6[%c0_9, %c0_10], %18 {strides = array<i32>} : memref<4x128xf32, #tpu.memory_space<vmem>>, vector<4x128xf32>,
    %c0_11 = arith.constant 0 : index
    %c0_12 = arith.constant 0 : index
    %20 = vector.load %arg7[%c0_11, %c0_12] : memref<4x128xf32, #tpu.memory_space<vmem>>, vector<4x128xf32>
    %21 = arith.addf %20, %10 : vector<4x128xf32>
    %c0_13 = arith.constant 0 : index
    %c0_14 = arith.constant 0 : index
    %22 = vector.load %arg7[%c0_13, %c0_14] : memref<4x128xf32, #tpu.memory_space<vmem>>, vector<4x128xf32>
    tpu.vector_store %arg7[%c0_13, %c0_14], %21 {strides = array<i32>} : memref<4x128xf32, #tpu.memory_space<vmem>>, vector<4x128xf32>,
    %c0_15 = arith.constant 0 : index
    %c0_16 = arith.constant 0 : index
    %23 = vector.load %arg8[%c0_15, %c0_16] : memref<4x128xf32, #tpu.memory_space<vmem>>, vector<4x128xf32>
    %24 = arith.extui %14 : vector<4x128xi1> to vector<4x128xi32>
    %25 = arith.sitofp %24 : vector<4x128xi32> to vector<4x128xf32>
    %26 = arith.addf %23, %25 : vector<4x128xf32>
    %c0_17 = arith.constant 0 : index
    %c0_18 = arith.constant 0 : index
    %27 = vector.load %arg8[%c0_17, %c0_18] : memref<4x128xf32, #tpu.memory_space<vmem>>, vector<4x128xf32>
    tpu.vector_store %arg8[%c0_17, %c0_18], %26 {strides = array<i32>} : memref<4x128xf32, #tpu.memory_space<vmem>>, vector<4x128xf32>,
    %c2_i32 = arith.constant 2 : i32
    %28 = arith.cmpi eq, %arg1, %c2_i32 : i32
    %29 = arith.extui %28 : i1 to i32
    %c0_i32_19 = arith.constant 0 : i32
    %30 = arith.cmpi ne, %29, %c0_i32_19 : i32
    scf.if %30 {
      %c0_20 = arith.constant 0 : index
      %c0_21 = arith.constant 0 : index
      %31 = vector.load %arg6[%c0_20, %c0_21] : memref<4x128xf32, #tpu.memory_space<vmem>>, vector<4x128xf32>
      %cst_22 = arith.constant dense<0.000000e+00> : vector<4xf32>
      %32 = vector.multi_reduction <add>, %31, %cst_22 [1] : vector<4x128xf32> to vector<4xf32>
      %33 = vector.shape_cast %32 : vector<4xf32> to vector<4x1xf32>
      %c0_23 = arith.constant 0 : index
      %c0_24 = arith.constant 0 : index
      %34 = vector.load %arg7[%c0_23, %c0_24] : memref<4x128xf32, #tpu.memory_space<vmem>>, vector<4x128xf32>
      %cst_25 = arith.constant dense<0.000000e+00> : vector<4xf32>
      %35 = vector.multi_reduction <add>, %34, %cst_25 [1] : vector<4x128xf32> to vector<4xf32>
      %36 = vector.shape_cast %35 : vector<4xf32> to vector<4x1xf32>
      %c0_26 = arith.constant 0 : index
      %c0_27 = arith.constant 0 : index
      %37 = vector.load %arg8[%c0_26, %c0_27] : memref<4x128xf32, #tpu.memory_space<vmem>>, vector<4x128xf32>
      %cst_28 = arith.constant dense<0.000000e+00> : vector<4xf32>
      %38 = vector.multi_reduction <add>, %37, %cst_28 [1] : vector<4x128xf32> to vector<4xf32>
      %39 = vector.shape_cast %38 : vector<4xf32> to vector<4x1xf32>
      %40 = arith.addf %36, %39 : vector<4x1xf32>
      %41 = vector.shape_cast %33 : vector<4x1xf32> to vector<1x4x1xf32>
      %c0_29 = arith.constant 0 : index
      %c0_30 = arith.constant 0 : index
      %c0_31 = arith.constant 0 : index
      %42 = vector.load %arg4[%c0_29, %c0_30, %c0_31] : memref<1x4x1xf32, #tpu.memory_space<vmem>>, vector<1x4x1xf32>
      tpu.vector_store %arg4[%c0_29, %c0_30, %c0_31], %41 {strides = array<i32>} : memref<1x4x1xf32, #tpu.memory_space<vmem>>, vector<1x4x1xf32>,
      %43 = vector.shape_cast %40 : vector<4x1xf32> to vector<1x4x1xf32>
      %c0_32 = arith.constant 0 : index
      %c0_33 = arith.constant 0 : index
      %c0_34 = arith.constant 0 : index
      %44 = vector.load %arg5[%c0_32, %c0_33, %c0_34] : memref<1x4x1xf32, #tpu.memory_space<vmem>>, vector<1x4x1xf32>
      tpu.vector_store %arg5[%c0_32, %c0_33, %c0_34], %43 {strides = array<i32>} : memref<1x4x1xf32, #tpu.memory_space<vmem>>, vector<1x4x1xf32>,
    } else {
    }
    return
  }
  func.func @transform_0(%arg0: i32, %arg1: i32) -> (i32, i32) {
    %c3_i32 = arith.constant 3 : i32
    %0 = arith.muli %arg0, %c3_i32 : i32
    %1 = arith.addi %0, %arg1 : i32
    %c0_i32 = arith.constant 0 : i32
    %c0_i32_0 = arith.constant 0 : i32
    return %c0_i32, %1 : i32, i32
  }
  func.func @transform_1(%arg0: i32, %arg1: i32) -> (i32, i32) {
    %c3_i32 = arith.constant 3 : i32
    %0 = arith.muli %arg0, %c3_i32 : i32
    %1 = arith.addi %0, %arg1 : i32
    %c0_i32 = arith.constant 0 : i32
    %c0_i32_0 = arith.constant 0 : i32
    return %c0_i32, %1 : i32, i32
  }
  func.func @transform_2(%arg0: i32, %arg1: i32) -> (i32, i32, i32) {
    %c0_i32 = arith.constant 0 : i32
    %c0_i32_0 = arith.constant 0 : i32
    %c0_i32_1 = arith.constant 0 : i32
    return %arg0, %c0_i32, %c0_i32_0 : i32, i32, i32
  }
  func.func @transform_3(%arg0: i32, %arg1: i32) -> (i32, i32, i32) {
    %c0_i32 = arith.constant 0 : i32
    %c0_i32_0 = arith.constant 0 : i32
    %c0_i32_1 = arith.constant 0 : i32
    return %arg0, %c0_i32, %c0_i32_0 : i32, i32, i32
  }
}

</mosaic_0001>

<bundles_post_ra>
// kernel: tpu_custom_call.1
= control target key start
LH: loop header
LB: loop body
LE: loop exit
PB: predicated region body
PF: predicated region fallthrough
CT: control target
= control target key end

     0   :  { %9 = vsyncpa [#allocation6], 0  ;;  %s856_s0 = inlined_call_operand.hbm [shape: f32[4,768], index: 0, kind: input, shape index: {}]   ;;  %s857_s1 = inlined_call_operand.hbm [shape: s32[1,768], index: 1, kind: input, shape index: {}]   ;;  %s858_s2 = inlined_call_operand.vmem [shape: f32[2,4,1], index: 2, kind: output, shape index: {0}]   ;;  %s859_s3 = inlined_call_operand.vmem [shape: f32[2,4,1], index: 3, kind: output, shape index: {1}]  }
   0x1   :  { %11 = vsyncpa [#allocation6 + $0x1], 0 }
   0x2   :  { %12 = vsyncpa [#allocation8], 0 }
   0x3   :  { %14 = vsyncpa [#allocation8 + $0x1], 0  ;;  %s692_s12 = smov 0   ;;  %s694_s13 = smov 0  }
   0x4   :  { %s696_s14 = smov 0   ;;  %s698_s15 = smov 0  }
   0x5   :  { %s700_s16 = smov 0   ;;  %s702_s17 = smov 0  }
   0x6   :  { %s704_s18 = smov 0   ;;  %s706_s19 = smov 0  }
   0x7 LB: > { %s443_s20 = sadd.s32 4294967295, %s666_s19   ;;  %s29_s21 = sadd.s32 1, %s658_s17  ;;  %s666_s19 = sphi %s706_s19, %s20_s19   ;;  %s662_s18 = sphi %s704_s18, %s870_s18   ;;  %s658_s17 = sphi %s702_s17, %s869_s17   ;;  %s654_s16 = sphi %s700_s16, %s868_s16   ;;  %s650_s15 = sphi %s698_s15, %s867_s15   ;;  %s646_s14 = sphi %s696_s14, %s866_s14   ;;  %s642_s13 = sphi %s694_s13, %s865_s13   ;;  %s638_s12 = sphi %s692_s12, %s864_s12  }
   0x8   : > { %p30_p0 = scmp.ge.s32.totalorder %s29_s21, 3  ;;  %s32_s22 = sadd.s32 1, %s662_s18 }
   0x9   : > { %s36_s23 = smul.u32 3, %s662_s18  ;;  %s43_s24 = sadd.s32 1, %s646_s14 }
   0xa   : > { %s872_s21 = smov (%p30_p0, %s29_s21), 0  ;;  %s874_s22 = smov (!%p30_p0, %s32_s22), %s662_s18 }
   0xb   : > { %s739_s25 = sadd.s32 %s658_s17, %s36_s23  ;;  %p50_p1 = scmp.ne.s32.totalorder %s646_s14, %s642_s13 }
   0xc   : > { %p34_p2 = scmp.ge.s32.totalorder %s874_s22, 2  ;;  %p51_p3 = scmp.eq.s32.totalorder %s666_s19, 0 }
   0xd   : > { %p56_p4 = scmp.ne.s32.totalorder %s642_s13, %s638_s12  ;;  %p57_p5 = scmp.eq.s32.totalorder %s443_s20, 0 }
   0xe   : > { %s876_s22 = smov (%p34_p2, %s874_s22), 0  ;;  %p747_p6 = por %p51_p3, %p50_p1 }
   0xf   : > { %p751_p7 = por %p57_p5, %p56_p4  ;;  %s38_s28 = smul.u32 3, %s876_s22 }
  0x10   : > { %p471_p8 = scmp.lt.s32.totalorder %s666_s19, 6  ;;  %s758_s29 = sand.u32 1, %s646_s14  }
  0x11   : > { %s39_s30 = sadd.s32 %s38_s28, %s872_s21  ;;  %s447_s5 = sshll.u32 %s758_s29, 2 }
  0x12   : > { %s40_s4 = ssub.s32 %s739_s25, %s39_s30  ;;  %s448_s6 = sshll.u32 %s739_s25, 6 }
  0x13   : > { %p41_p9 = scmp.eq.s32.totalorder %s40_s4, 0  ;;  %s166_s7 = scalar_lea.vmem [#allocation5], %s447_s5 }
  0x14   : > { %s175_s8 = sshll.u32 %s166_s7, 4  ;;  %s173_s12 = scalar_lea.hbm %s856_s0, %s448_s6  ;;  %s176_s8 = int_to_ptr.vmem [resolvable:$true] %s175_s8 }
  0x15   : > { %s765_s9 = scalar_select %p41_p9, %s646_s14, %s43_s24  }
  0x16   : > { %p772_p10 = pnand %p471_p8, %p747_p6  ;;  %p450_p11 = scmp.ge.s32.totalorder %s666_s19, 1 }
  0x17   : > { %p199_p12 = scmp.lt.s32.totalorder %s666_s19, 7  ;;  %s163_s23 = scalar_lea.sflag [#allocation6], %s758_s29 }
  0x18   : > { %p542_p13 = pneg %p772_p10  ;;  %s553_s28 = scalar_lea.vmem %s176_s8, 64 }
  0x19   : > { %p554_p0 = scmp.ne.s32.totalorder %s176_s8, %s553_s28  ;;  %s668_s24 = smov [#allocation5]  }
  0x1a   : > { %s558_s30 = sshll.u32 %s668_s24, 4  ;;  %s559_s30 = int_to_ptr.vmem [resolvable:$false] %s558_s30 }
  0x1b   : > { %p556_p1 = pnand %p554_p0, %p542_p13  ;;  %s560_s26 = scalar_lea.vmem %s559_s30, 128 }
  0x1c   : > { %p561_p3 = scmp.lt.s32.totalorder %s176_s8, %s559_s30  ;;  %p562_p4 = scmp.lt.s32.totalorder %s560_s26, %s553_s28 }
  0x1d   : > { %p557_p2 = pneg %p556_p1 }
  0x1e   : > { %p563_p5 = por %p562_p4, %p561_p3 }
  0x20   : > { %p564_p6 = pnand %p563_p5, %p557_p2 }
  0x22   : > { %567 = shalt.err (!%p564_p6)
}
  0x23   : > { %467 = dma.hbm_to_vmem [thread:$0]  (!%p772_p10), %s173_s12, 64, %s176_s8, %s163_s23  }
  0x24   : > { %p790_p8 = pnand %p450_p11, %p199_p12  ;;  %s449_s5 = sshll.u32 %s739_s25, 4 }
  0x25   : > { %s192_s10 = scalar_lea.hbm %s857_s1, %s449_s5  ;;  %s185_s11 = scalar_lea.vmem [#allocation7], %s758_s29 }
  0x26   : > { %s194_s28 = sshll.u32 %s185_s11, 4  ;;  %s183_s24 = scalar_lea.sflag [#allocation8], %s758_s29  ;;  %s195_s28 = int_to_ptr.vmem [resolvable:$true] %s194_s28 }
  0x27   : > { %s581_s30 = scalar_lea.vmem %s195_s28, 16  ;;  %s669_s8 = smov [#allocation7]  }
  0x28   : > { %p582_p9 = scmp.ne.s32.totalorder %s195_s28, %s581_s30  ;;  %s586_s12 = sshll.u32 %s669_s8, 4  ;;  %s587_s12 = int_to_ptr.vmem [resolvable:$false] %s586_s12 }
  0x29   : > { %s588_s23 = scalar_lea.vmem %s587_s12, 32  ;;  %p589_p11 = scmp.lt.s32.totalorder %s195_s28, %s587_s12 }
  0x2a   : > { %p584_p0 = pnand %p582_p9, %p542_p13  ;;  %p590_p12 = scmp.lt.s32.totalorder %s588_s23, %s581_s30 }
  0x2c   : > { %p585_p1 = pneg %p584_p0  ;;  %p591_p2 = por %p590_p12, %p589_p11 }
  0x2e   : > { %p592_p3 = pnand %p591_p2, %p585_p1 }
  0x30   : > { %595 = shalt.err (!%p592_p3)
}
  0x31   : > { %470 = dma.hbm_to_vmem [thread:$0]  (!%p772_p10), %s192_s10, 16, %s195_s28, %s183_s24  }
  0x32   : > { %203 = sbr.rel (%p790_p8) target bundleno = 245 (0xf5), region = 28  ;;  %s205_s25 = sand.u32 (!%p790_p8), 1, %s642_s13  }
  0x33   : > { %s451_s29 = sshll.u32 (!%p790_p8), %s205_s25, 2  ;;  %s206_s26 = scalar_lea.sflag (!%p790_p8), [#allocation6], %s205_s25 }
  0x34   : > { %s209_s5 = scalar_lea.vmem (!%p790_p8), [#allocation5], %s451_s29 }
  0x37   : > { %629 = dma.done.wait (%p751_p7), %s206_s26, 64  }
  0x38   : > { %631 = vsyncadd (%p751_p7), %s206_s26, 4294967232  ;;  %s215_s6 = scalar_lea.sflag [#allocation8], %s205_s25  ;;  %s217_s7 = scalar_lea.vmem [#allocation7], %s205_s25 }
  0x39   : > { %633 = dma.done.wait (%p751_p7), %s215_s6, 16  }
  0x3a   : > { %635 = vsyncadd (%p751_p7), %s215_s6, 4294967280  ;;  %p251_p10 = scmp.lt.s32.totalorder %s654_s16, 1  ;;  %p454_p13 = scmp.ne.s32.totalorder %s650_s15, 0 }
  0x3c   : > { %s878_s16 = smov (!%p251_p10, %s654_s16), 1  ;;  %262 = sbr.rel (%p454_p13) target bundleno = 68 (0x44), region = 40 }
  0x3d   : > { %s452_s20 = sshll.u32 %s878_s16, 2 }
  0x3e   : > { %s821_s11 = scalar_lea.vmem %s858_s2, %s452_s20  ;;  %s826_s30 = scalar_lea.vmem %s859_s3, %s452_s20 }
  0x41   : > { %v670_v0 = vmov 0.0  }
  0x42   : > { %263 = vst [vmem:[#allocation2] sm:$0xf] %v670_v0  ;;  %264 = vst [vmem:[#allocation3] sm:$0xf] %v670_v0 }
  0x43   : > { %265 = vst [vmem:[#allocation4] sm:$0xf] %v670_v0 }
  0x44 PF: > { %v266_v1 = vld [vmem:[%s209_s5] sm:$0xf]  ;;  %v271_v2 = vlaneseq  ;;  %v455_v4 = vld [vmem:[%s217_s7] ss:$0 sm:$0xff]  ;;  %v671_v7 = vmov 0.0   ;;  %p457_p7 = scmp.ne.s32.totalorder %s650_s15, 2 }
  0x45   : > { %v267_v3 = vmul.f32 0.5, %v266_v1 }
  0x46   : > { %v272_v5 = vshrl.u32 %v271_v2, 7 }
  0x47   : > { %538 = vtanh.f32 %v267_v3 }
  0x48   : > { %vm278_vm0 = vcmp.eq.s32.totalorder %v455_v4, %v272_v5 }
  0x49   : > { %v456_v8 = vsel %vm278_vm0, 1.0, %v671_v7  ;;  %v283_v12 = vld [vmem:[#allocation3] sm:$0xf]  ;;  %v279_v14 = vld [vmem:[#allocation2] sm:$0xf] }
  0x4a   : > { %v286_v6 = vld [vmem:[#allocation4] sm:$0xf] }
  0x4b   : > { %v289_v9 = vadd.f32 %v456_v8, %v286_v6 }
  0x4d   : > { %290 = vst [vmem:[#allocation4] sm:$0xf] %v289_v9 }
  0x54   : > { %v539_v10 = vpop.eup %538 }
  0x55   : > { %v269_v11 = vadd.f32 1.0, %v539_v10 }
  0x57   : > { %v270_v13 = vmul.f32 0.5, %v269_v11 }
  0x58   : > { %294 = sbr.rel (%p457_p7) target bundleno = 245 (0xf5), region = 44 }
  0x59   : > { %v280_v15 = vsel %vm278_vm0, %v270_v13, 0.0  ;;  %v284_v16 = vadd.f32 %v283_v12, %v270_v13 }
  0x5a   : > { %v281_v17 = vadd.f32 %v280_v15, %v279_v14 }
  0x5b   : > { %285 = vst [vmem:[#allocation3] sm:$0xf] %v284_v16 }
  0x5c   : > { %282 = vst [vmem:[#allocation2] sm:$0xf] %v281_v17 }
  0x5d   : > { %vm296_vm1 = vcmask 1043456   ;;  %v304_v19 = vld [vmem:[#allocation4] sm:$0xf]  ;;  %vm309_vm2 = vcmask 3072  }
  0x5e   : > { %v305_v23 = vsel %vm296_vm1, %v304_v19, 0.0 }
  0x62   : > { %v300_v18 = vld [vmem:[#allocation3] sm:$0xf] }
  0x63   : > { %v301_v20 = vsel %vm296_vm1, %v300_v18, 0.0  ;;  %v295_v21 = vld [vmem:[#allocation2] sm:$0xf] }
  0x64   : > { %302 = vadd.xlane.f32.xlu0 %v301_v20  ;;  %v297_v22 = vsel %vm296_vm1, %v295_v21, 0.0 }
  0x65   : > { %298 = vadd.xlane.f32.xlu1 %v297_v22 }
  0x68   : > { %306 = vadd.xlane.f32.xlu0 %v305_v23 }
  0xed   : > { %v303_v24 = vpop.xlane.xlu0 %302 }
  0xee   : > { %v299_v25 = vpop.xlane.xlu1 %298 }
  0xef   : > { %310 = vst.msk [vmem:[%s821_s11] sm:$0xf] %vm309_vm2, %v299_v25 }
  0xf1   : > { %v307_v26 = vpop.xlane.xlu0 %306 }
  0xf2   : > { %v308_v27 = vadd.f32 %v307_v26, %v303_v24 }
  0xf4   : > { %311 = vst.msk [vmem:[%s826_s30] sm:$0xf] %vm309_vm2, %v308_v27 }
  0xf5 PF: > { %s20_s19 = sadd.s32 1, %s666_s19   ;;  %s864_s12 = smov %s642_s13 }
  0xf6   : > { %p17_p4 = scmp.ge.s32.totalorder %s20_s19, 8   ;;  %s865_s13 = smov %s646_s14 }
  0xf7   : > { %s866_s14 = smov %s765_s9  ;;  %s867_s15 = smov %s658_s17 }
  0xf8   : > { %s868_s16 = smov %s662_s18  ;;  %s869_s17 = smov %s872_s21 }
  0xf9   : > { %s870_s18 = smov %s876_s22  ;;  %19 = sbr.rel (!%p17_p4) target bundleno = 7 (0x7), region = 101 }
  0xfe   :  { %345 = vsyncpa [#allocation6], 1 }
  0xff   :  { %347 = vsyncpa [#allocation6 + $0x1], 1 }
 0x100   :  { %348 = vsyncpa [#allocation8], 1 }
 0x101   :  { %350 = vsyncpa [#allocation8 + $0x1], 1 }

</bundles_post_ra>
